<compile_context>
chip_gen: v7x
topology: tpu7x:2x2x1
jax: 0.10.0
libtpu: 0.0.40
codegen_flags: <defaults>
</compile_context>

<pallas_src>
import jax
import jax.numpy as jnp
from jax.experimental import pallas as pl
from jax.experimental.pallas import tpu as pltpu


def _round_up(v, m):
    return ((v + m - 1) // m) * m


def _select_matmul_kernel(choice_ref, x_ref, w_ref, o_ref):
    # choice_ref: (1,) int32 in SMEM (scalar prefetch; already consumed by the
    #             weight index_map, unused here).
    # x_ref: (Mp, Kp) f32, w_ref: (1, Kp, Np) f32 (the selected padded weight),
    # o_ref: (Mp, Np) f32.
    del choice_ref
    o_ref[...] = jnp.dot(
        x_ref[...], w_ref[0], preferred_element_type=jnp.float32
    ).astype(o_ref.dtype)


@jax.jit
def _pallas_dict_mm(x, w_stack, choice_idx):
    """Returns the padded (Mp, Np) result of x @ w_stack[choice_idx]."""
    M, K = x.shape
    _, Kp, Np = w_stack.shape
    assert K <= Kp, (K, Kp)
    Mp = _round_up(M, 8)

    # Only the activation needs per-call padding (it is a runtime input).
    x_pad = jnp.zeros((Mp, Kp), dtype=x.dtype).at[:M, :K].set(x)

    return pl.pallas_call(
        _select_matmul_kernel,
        out_shape=jax.ShapeDtypeStruct((Mp, Np), x.dtype),
        grid_spec=pltpu.PrefetchScalarGridSpec(
            num_scalar_prefetch=1,
            grid=(1,),
            in_specs=[
                # Full-array activation block.
                pl.BlockSpec((Mp, Kp), lambda i, c: (0, 0)),
                # Data-dependent weight selection: DMA only w_stack[choice].
                pl.BlockSpec((1, Kp, Np), lambda i, c: (c[0], 0, 0)),
            ],
            out_specs=pl.BlockSpec((Mp, Np), lambda i, c: (0, 0)),
        ),
        compiler_params=pltpu.CompilerParams(
            dimension_semantics=("arbitrary",),
        ),
    )(choice_idx, x_pad, w_stack)


class MyDictDense:
    """JAX/Pallas port of the PyTorch MyDictDense module."""

    _KP = 8     # in_features (4) padded to the sublane multiple
    _NP = 128   # common padded out_features (lane multiple)

    def __init__(self, key):
        k1, k2, k3 = jax.random.split(key, 3)
        # Same shapes as the nn.ParameterDict in the reference module,
        # deterministically initialized (standard normal, like torch.randn).
        self.params = {
            "linear1": jax.random.normal(k1, (4, 4), dtype=jnp.float32),
            "linear2": jax.random.normal(k2, (4, 1), dtype=jnp.float32),
            "linear3": jax.random.normal(k3, (4, 2), dtype=jnp.float32),
        }
        self._names = ("linear1", "linear2", "linear3")
        self._choice_to_idx = {n: i for i, n in enumerate(self._names)}
        self._out_features = {n: self.params[n].shape[1] for n in self._names}

        # One-time weight padding + stacking (hoisted out of the hot path).
        stack = jnp.zeros((len(self._names), self._KP, self._NP), jnp.float32)
        for i, n in enumerate(self._names):
            w = self.params[n]
            stack = stack.at[i, : w.shape[0], : w.shape[1]].set(w)
        self._w_stack = jax.device_put(stack)

    def __call__(self, x, choice="linear1"):
        idx = jnp.asarray([self._choice_to_idx[choice]], dtype=jnp.int32)
        out_pad = _pallas_dict_mm(x, self._w_stack, idx)
        M = x.shape[0]
        N = self._out_features[choice]
        return out_pad[:M, :N]


if __name__ == "__main__":
    key = jax.random.PRNGKey(0)
    net = MyDictDense(key)

    # Same input as the reference script: x = torch.ones(1, 4)
    x = jnp.ones((1, 4), dtype=jnp.float32)

    outs = {}
    for choice in ("linear1", "linear2", "linear3"):
        out = net(x, choice=choice)
        jax.block_until_ready(out)
        outs[choice] = out

    # Correctness check against the plain-JAX reference.
    for choice, out in outs.items():
        ref = x @ net.params[choice]
        assert out.shape == ref.shape, (choice, out.shape, ref.shape)
        assert jnp.allclose(out, ref, atol=1e-5, rtol=1e-5), choice

    print("KERNEL_OK")
</pallas_src>

<mosaic_0001>
module attributes {stable_mosaic.version = 11 : i64} {
  func.func @_select_matmul_kernel(%arg0: i32, %arg1: memref<1xi32, #tpu.memory_space<smem>>, %arg2: memref<8x8xf32, #tpu.memory_space<vmem>>, %arg3: memref<1x8x128xf32, #tpu.memory_space<vmem>>, %arg4: memref<8x128xf32, #tpu.memory_space<vmem>>) attributes {dimension_semantics = [#tpu.dimension_semantics<arbitrary>], iteration_bounds = array<i64: 1>, scalar_prefetch = 1 : i64, scratch_operands = 0 : i64, tpu.core_type = #tpu.core_type<tc>, window_params = [{pipeline_mode = #tpu.pipeline_mode<synchronous>, transform_indices = @transform_0, window_bounds = array<i64: 8, 8>}, {transform_indices = @transform_1, window_bounds = array<i64: 1, 8, 128>}, {pipeline_mode = #tpu.pipeline_mode<synchronous>, transform_indices = @transform_2, window_bounds = array<i64: 8, 128>}]} {
    %c0 = arith.constant 0 : index
    %c0_0 = arith.constant 0 : index
    %0 = vector.load %arg2[%c0, %c0_0] : memref<8x8xf32, #tpu.memory_space<vmem>>, vector<8x8xf32>
    %c0_1 = arith.constant 0 : index
    %c0_2 = arith.constant 0 : index
    %c0_3 = arith.constant 0 : index
    %1 = vector.load %arg3[%c0_1, %c0_2, %c0_3] : memref<1x8x128xf32, #tpu.memory_space<vmem>>, vector<1x8x128xf32>
    %2 = vector.shape_cast %1 : vector<1x8x128xf32> to vector<8x128xf32>
    %cst = arith.constant dense<0.000000e+00> : vector<8x128xf32>
    %3 = tpu.matmul %0, %2, %cst {dimension_numbers = #tpu.dot_dimension_numbers<[1], [0], [0], [1], [0, 0, 1, 1], [], []>} : vector<8x8xf32>, vector<8x128xf32>, vector<8x128xf32> -> vector<8x128xf32>
    %c0_4 = arith.constant 0 : index
    %c0_5 = arith.constant 0 : index
    %4 = vector.load %arg4[%c0_4, %c0_5] : memref<8x128xf32, #tpu.memory_space<vmem>>, vector<8x128xf32>
    tpu.vector_store %arg4[%c0_4, %c0_5], %3 {strides = array<i32>} : memref<8x128xf32, #tpu.memory_space<vmem>>, vector<8x128xf32>,
    return
  }
  func.func @transform_0(%arg0: i32, %arg1: memref<1xi32, #tpu.memory_space<smem>>) -> (i32, i32) {
    %c0_i32 = arith.constant 0 : i32
    %c0_i32_0 = arith.constant 0 : i32
    %c0_i32_1 = arith.constant 0 : i32
    return %c0_i32, %c0_i32_0 : i32, i32
  }
  func.func @transform_1(%arg0: i32, %arg1: memref<1xi32, #tpu.memory_space<smem>>) -> (i32, i32, i32) {
    %c0 = arith.constant 0 : index
    %0 = memref.load %arg1[%c0] : memref<1xi32, #tpu.memory_space<smem>>
    %c0_i32 = arith.constant 0 : i32
    %c0_i32_0 = arith.constant 0 : i32
    %c0_i32_1 = arith.constant 0 : i32
    return %0, %c0_i32, %c0_i32_0 : i32, i32, i32
  }
  func.func @transform_2(%arg0: i32, %arg1: memref<1xi32, #tpu.memory_space<smem>>) -> (i32, i32) {
    %c0_i32 = arith.constant 0 : i32
    %c0_i32_0 = arith.constant 0 : i32
    %c0_i32_1 = arith.constant 0 : i32
    return %c0_i32, %c0_i32_0 : i32, i32
  }
}

</mosaic_0001>

<bundles_post_ra>
// kernel: _pallas_dict_mm.1
= control target key start
LH: loop header
LB: loop body
LE: loop exit
PB: predicated region body
PF: predicated region fallthrough
CT: control target
= control target key end

     0   :  { %9 = vsyncpa [#allocation5], 0  ;;  %s238_s0 = inlined_call_operand.<no memory space> [shape: s32[1], index: 0, kind: input, shape index: {}]   ;;  %s239_s1 = inlined_call_operand.vmem [shape: f32[8,8], index: 1, kind: input, shape index: {}]   ;;  %s240_s2 = inlined_call_operand.hbm [shape: f32[3,8,128], index: 2, kind: input, shape index: {}]   ;;  %s241_s3 = inlined_call_operand.hbm [shape: f32[8,128], index: 3, kind: output, shape index: {}]  }
   0x1   :  { %10 = vsyncpa [#allocation6], 0  ;;  %s124_s14 = sshll.u32 %s238_s0, 7  ;;  %s187_s18 = smov [#allocation4]  }
   0x2   :  { %s20_s17 = scalar_lea.hbm %s240_s2, %s124_s14  ;;  %s22_s19 = sshll.u32 %s187_s18, 4  ;;  %s23_s19 = int_to_ptr.vmem [resolvable:$true] %s22_s19 }
   0x3   :  { %s137_s20 = scalar_lea.hbm %s20_s17, 128  ;;  %s139_s23 = scalar_lea.hbm %s240_s2, 384 }
   0x4   :  { %p138_p0 = scmp.ne.s32.totalorder %s20_s17, %s137_s20  ;;  %p140_p1 = scmp.lt.u32.totalorder %s20_s17, %s240_s2 }
   0x5   :  { %p141_p2 = scmp.lt.u32.totalorder %s139_s23, %s137_s20  ;;  %p143_p4 = scmp.lt.u32.totalorder %s137_s20, %s20_s17 }
   0x7   :  { %p142_p3 = por %p141_p2, %p140_p1 }
   0x9   :  { %p144_p5 = por %p143_p4, %p142_p3 }
   0xb   :  { %p145_p6 = pnand %p144_p5, %p138_p0 }
   0xd   :  { %148 = shalt.err (!%p145_p6)
}
   0xe   :  { %s149_s0 = scalar_lea.vmem %s23_s19, 128  ;;  %p154_p8 = scmp.lt.s32.totalorder %s23_s19, %s23_s19 }
   0xf   :  { %p150_p7 = scmp.ne.s32.totalorder %s23_s19, %s149_s0  ;;  %p155_p9 = scmp.lt.s32.totalorder %s149_s0, %s149_s0 }
  0x11   :  { %p156_p10 = por %p155_p9, %p154_p8 }
  0x13   :  { %p157_p11 = pnand %p156_p10, %p150_p7 }
  0x15   :  { %160 = shalt.err (!%p157_p11)
}
  0x16   :  { %25 = dma.hbm_to_vmem [thread:$0]  %s20_s17, 128, %s23_s19, [#allocation5]  }
  0x17   :  { %183 = dma.done.wait [#allocation5], 128  }
  0x18   :  { %184 = vsyncadd [#allocation5], 4294967168  ;;  %v188_v0 = vmov 0.0   ;;  %vm189_vm0 = vmmov 0   ;;  %vm32_vm1 = vcmask 64512   ;;  %v31_v1 = vld [vmem:[#allocation4] sm:$0xff] }
  0x19   :  { %128 = vmatprep.subr.mxu0 %v188_v0  ;;  %130 = vmatprep.mubr.msk.f32.mxu0 %vm189_vm0, %v188_v0  ;;  %v30_v2 = vld [vmem:[%s239_s1] sm:$0xff]  ;;  %s190_s27 = smov [#allocation7]  }
  0x1a   :  { %129 = vmatpush3.msra.mxu0 %v31_v1  ;;  %s113_s28 = sshll.u32 %s190_s27, 4  ;;  %s114_s28 = int_to_ptr.vmem [resolvable:$true] %s113_s28 }
  0x1b   :  { %131 = vmatmul.mubr.msk.f32.vlgmr.msra.gmra.mrb[0].mxu0 %vm32_vm1, %v30_v2  ;;  %s161_s29 = scalar_lea.vmem %s114_s28, 128  ;;  %p166_p13 = scmp.lt.s32.totalorder %s114_s28, %s114_s28 }
  0x1c   :  { %p162_p12 = scmp.ne.s32.totalorder %s114_s28, %s161_s29  ;;  %p167_p0 = scmp.lt.s32.totalorder %s161_s29, %s161_s29 }
  0x1e   :  { %p168_p1 = por %p167_p0, %p166_p13 }
  0x20   :  { %p169_p2 = pnand %p168_p1, %p162_p12 }
  0xee   :  { %v102_v3 = vpop.f32.mrb[0].mxu0 }
  0xef   :  { %106 = vst [vmem:[#allocation7] sm:$0xff] %v102_v3  ;;  %v132_v4 = vpop.f32.mrb[1].mxu0 }
  0xf0   :  { %172 = shalt.err (!%p169_p2)
}
  0xf1   :  { %s173_s5 = scalar_lea.hbm %s241_s3, 128 }
  0xf2   :  { %p174_p3 = scmp.ne.s32.totalorder %s241_s3, %s173_s5  ;;  %p177_p4 = scmp.lt.u32.totalorder %s173_s5, %s241_s3 }
  0xf4   :  { %p179_p5 = pnand %p177_p4, %p174_p3 }
  0xf6   :  { %182 = shalt.err (!%p179_p5)
}
  0xf7   :  { %116 = dma.vmem_to_hbm [thread:$0]  %s114_s28, 128, %s241_s3, [#allocation6]  }
  0xf8   :  { %185 = dma.done.wait [#allocation6], 128  }
  0xf9   :  { %186 = vsyncadd [#allocation6], 4294967168 }
  0xfa   :  { %120 = vsyncpa [#allocation5], 1 }
  0xfb   :  { %121 = vsyncpa [#allocation6], 1 }

</bundles_post_ra>
